<compile_context>
chip_gen: v7x
topology: tpu7x:2x2x1
jax: 0.10.0
libtpu: 0.0.40
codegen_flags: <defaults>
</compile_context>

<pallas_src>
import math

import jax
import jax.numpy as jnp
from jax import lax
from jax.experimental import pallas as pl
from jax.experimental.pallas import tpu as pltpu


def _round_up(x, m):
    return (x + m - 1) // m * m


def _make_kernel(C, feape):
    log3 = math.log(3.0)

    def kernel(xin_ref, w1_ref, b1_ref, w2_ref, b2_ref, out_ref):
        # xin_ref: (C+3, tn) = [features ; pts[:3]]^T  (row axis = lanes)
        x = xin_ref[...].astype(jnp.float32)
        feat = x[0:C, :]                                   # (C, tn), aligned slice

        # Frequency-major positional-encoding phases: rows [f*C:(f+1)*C] = feat * 2^f.
        pieces = [feat * jnp.float32(2.0 ** f) for f in range(feape)]
        scaled = jnp.concatenate(pieces, axis=0)           # (feape*C, tn)
        posenc = jnp.concatenate([jnp.sin(scaled), jnp.cos(scaled)], axis=0)

        # mlp_in^T with rows ordered [sinPE | cosPE | features | pts], matching w1_t.
        mlp_in = jnp.concatenate([posenc, x], axis=0)      # (in_mlpC, tn)

        # Layer 1 (single MXU call) + ReLU.
        h = jnp.dot(w1_ref[...], mlp_in, preferred_element_type=jnp.float32)
        h = jnp.maximum(h + b1_ref[...], 0.0)              # (H, tn)

        # Layer 2 (single MXU call).
        out = jnp.dot(w2_ref[...], h, preferred_element_type=jnp.float32) + b2_ref[...]
        z = out[2:3, :]                                    # (1, tn)

        # Pack all heads into one (8, tn) pre-activation block -> one sigmoid.
        pre = jnp.concatenate(
            [
                out - jnp.float32(log3),     # rows 0:3  diffuse
                jnp.clip(out, -10.0, 10.0),  # rows 3:6  tint
                z - 2.0,                     # row  6    ambient
                z - 1.0,                     # row  7    roughness (pre-clip)
            ],
            axis=0,
        )
        act = 1.0 / (1.0 + jnp.exp(-pre))
        # roughness floor (sigmoid > 0, so max with 0 is a no-op for other rows)
        floor = jnp.where(
            lax.broadcasted_iota(jnp.int32, (8, 1), 0) == 7, 0.01, 0.0
        ).astype(jnp.float32)
        out_ref[...] = jnp.maximum(act, floor).astype(out_ref.dtype)

    return kernel


def mlp_render(pts, viewdirs, features, params, *, feape=6, tile_n=4096):
    """Pallas implementation of MLPRender.forward (pospe=0, view_encoder=None).

    pts:      (..., >=4)  -- only pts[..., :3] is used (size channel unused).
    viewdirs: (..., 3)    -- unused (view_encoder is None), kept for parity.
    features: (..., C)
    params:   dict(w1=(in_mlpC, H), b1=(H,), w2=(H, 3), b2=(3,))
              with in_mlpC = 3 + C + 2*feape*C.
    returns:  (diffuse, tint, dict(ambient, diffuse, roughness, tint))
    """
    del viewdirs  # view_encoder is None in this configuration
    w1, b1, w2, b2 = params["w1"], params["b1"], params["w2"], params["b2"]

    batch_shape = features.shape[:-1]
    C = features.shape[-1]
    H = w1.shape[-1]
    in_mlpC = 3 + C + 2 * feape * C
    assert w1.shape == (in_mlpC, H), (w1.shape, in_mlpC, H)
    assert pts.shape[:-1] == batch_shape and pts.shape[-1] >= 3
    assert feape >= 1

    out_dtype = features.dtype

    # ---- wrapper-side layout plumbing (cheap, weight-/row-sized) ----
    pts2d = pts.reshape(-1, pts.shape[-1])
    feat2d = features.reshape(-1, C)
    N = feat2d.shape[0]

    # One input stream [features | pts3], transposed so rows map to lanes.
    xin = jnp.concatenate([feat2d, pts2d[:, :3].astype(feat2d.dtype)], axis=-1)  # (N, C+3)

    # Row tile: multiple of 128 lanes, >=2 grid steps when possible (v7x dual TC).
    tn = int(tile_n)
    tn = min(tn, _round_up(pl.cdiv(N, 2), 128))
    tn = _round_up(max(tn, 128), 128)
    n_pad = _round_up(N, tn)
    num_tiles = n_pad // tn
    if n_pad > N:
        xin = jnp.pad(xin, ((0, n_pad - N), (0, 0)))
    xin_t = xin.T                                           # (C+3, n_pad)

    # Reorder W1 rows to [sinPE(freq-major) | cosPE(freq-major) | features | pts]
    # and transpose, so the kernel does one dense matmul against mlp_in^T.
    w1 = w1.astype(jnp.float32)
    w1_pts = w1[0:3]
    w1_feat = w1[3:3 + C]
    w1_sin = w1[3 + C:3 + C + feape * C]                    # channel-major rows
    w1_cos = w1[3 + C + feape * C:]
    w1_sin = w1_sin.reshape(C, feape, H).transpose(1, 0, 2).reshape(feape * C, H)
    w1_cos = w1_cos.reshape(C, feape, H).transpose(1, 0, 2).reshape(feape * C, H)
    w1_t = jnp.concatenate([w1_sin, w1_cos, w1_feat, w1_pts], axis=0).T  # (H, in_mlpC)
    b1_col = b1.reshape(H, 1).astype(jnp.float32)
    w2_t = w2.astype(jnp.float32).T                         # (3, H)
    b2_col = b2.reshape(3, 1).astype(jnp.float32)

    kernel = _make_kernel(C, feape)

    grid_spec = pl.GridSpec(
        grid=(num_tiles,),
        in_specs=[
            pl.BlockSpec((C + 3, tn), lambda i: (0, i)),          # [features|pts]^T rows
            pl.BlockSpec((H, in_mlpC), lambda i: (0, 0)),         # W1^T (resident)
            pl.BlockSpec((H, 1), lambda i: (0, 0)),               # b1
            pl.BlockSpec((3, H), lambda i: (0, 0)),               # W2^T
            pl.BlockSpec((3, 1), lambda i: (0, 0)),               # b2
        ],
        out_specs=pl.BlockSpec((8, tn), lambda i: (0, i)),        # packed heads
    )

    packed = pl.pallas_call(
        kernel,
        out_shape=jax.ShapeDtypeStruct((8, n_pad), jnp.float32),
        grid_spec=grid_spec,
        compiler_params=pltpu.CompilerParams(
            dimension_semantics=("parallel",),
        ),
    )(xin_t, w1_t, b1_col, w2_t, b2_col)

    packed = packed[:, :N]
    diffuse = packed[0:3].T.reshape(*batch_shape, 3).astype(out_dtype)
    tint = packed[3:6].T.reshape(*batch_shape, 3).astype(out_dtype)
    ambient = packed[6].reshape(batch_shape).astype(out_dtype)
    roughness = packed[7].reshape(batch_shape).astype(out_dtype)
    return diffuse, tint, dict(ambient=ambient, diffuse=diffuse,
                               roughness=roughness, tint=tint)


def _sigmoid(x):
    return 1.0 / (1.0 + jnp.exp(-x))


if __name__ == "__main__":
    key = jax.random.PRNGKey(0)
    kp, kv, kf, k1, k2, k3 = jax.random.split(key, 6)

    # Small shapes: batch=2, points=16, feature channels=8, hidden=32, feape=6.
    B, Pn, C, H, feape = 2, 16, 8, 32, 6
    in_mlpC = 3 + C + 2 * feape * C  # = 107

    pts = jax.random.normal(kp, (B, Pn, 4), dtype=jnp.float32)
    viewdirs = jax.random.normal(kv, (B, Pn, 3), dtype=jnp.float32)
    features = jax.random.normal(kf, (B, Pn, C), dtype=jnp.float32)

    params = dict(
        w1=0.1 * jax.random.normal(k1, (in_mlpC, H), dtype=jnp.float32),
        b1=0.1 * jax.random.normal(k2, (H,), dtype=jnp.float32),
        w2=0.1 * jax.random.normal(k3, (H, 3), dtype=jnp.float32),
        b2=jnp.zeros((3,), dtype=jnp.float32),  # torch.nn.init.constant_(bias, 0)
    )

    diffuse, tint, aux = mlp_render(pts, viewdirs, features, params, feape=feape)
    diffuse, tint, aux = jax.block_until_ready((diffuse, tint, aux))

    # ---- pure-JAX reference: exact replica of the PyTorch module's math ----
    # positional_encoding: pe[..., c*feape+f] = features[..., c] * 2**f (channel-major),
    # mlp_in = cat([pts3, features, sin(pe), cos(pe)]).
    p3 = pts[..., :3]
    freqs = 2.0 ** jnp.arange(feape, dtype=jnp.float32)
    pe = (features[..., None] * freqs).reshape(*features.shape[:-1], feape * C)
    posenc = jnp.concatenate([jnp.sin(pe), jnp.cos(pe)], axis=-1)
    mlp_in = jnp.concatenate([p3, features, posenc], axis=-1)
    h = jnp.maximum(mlp_in @ params["w1"] + params["b1"], 0.0)
    out = h @ params["w2"] + params["b2"]
    ref_ambient = _sigmoid(out[..., 2] - 2.0)
    ref_rough = jnp.maximum(_sigmoid(out[..., 2] - 1.0), 0.01)
    ref_tint = _sigmoid(jnp.clip(out[..., :3], -10.0, 10.0))
    ref_diffuse = _sigmoid(out[..., :3] - math.log(3.0))

    assert diffuse.shape == (B, Pn, 3) and tint.shape == (B, Pn, 3)
    assert aux["ambient"].shape == (B, Pn) and aux["roughness"].shape == (B, Pn)
    for name, got, want in [("diffuse", diffuse, ref_diffuse),
                            ("tint", tint, ref_tint),
                            ("ambient", aux["ambient"], ref_ambient),
                            ("roughness", aux["roughness"], ref_rough)]:
        err = float(jnp.max(jnp.abs(got - want)))
        assert jnp.allclose(got, want, atol=2e-3, rtol=2e-3), (name, err)

    print("KERNEL_OK")
</pallas_src>

<mosaic_0001>
module attributes {stable_mosaic.version = 11 : i64} {
  func.func @kernel(%arg0: i32, %arg1: memref<11x128xf32, #tpu.memory_space<vmem>>, %arg2: memref<32x107xf32, #tpu.memory_space<vmem>>, %arg3: memref<32x1xf32, #tpu.memory_space<vmem>>, %arg4: memref<3x32xf32, #tpu.memory_space<vmem>>, %arg5: memref<3x1xf32, #tpu.memory_space<vmem>>, %arg6: memref<8x128xf32, #tpu.memory_space<vmem>>) attributes {dimension_semantics = [#tpu.dimension_semantics<parallel>], iteration_bounds = array<i64: 1>, scalar_prefetch = 0 : i64, scratch_operands = 0 : i64, tpu.core_type = #tpu.core_type<tc>, window_params = [{transform_indices = @transform_0, window_bounds = array<i64: 11, 128>}, {pipeline_mode = #tpu.pipeline_mode<synchronous>, transform_indices = @transform_1, window_bounds = array<i64: 32, 107>}, {pipeline_mode = #tpu.pipeline_mode<synchronous>, transform_indices = @transform_2, window_bounds = array<i64: 32, 1>}, {pipeline_mode = #tpu.pipeline_mode<synchronous>, transform_indices = @transform_3, window_bounds = array<i64: 3, 32>}, {pipeline_mode = #tpu.pipeline_mode<synchronous>, transform_indices = @transform_4, window_bounds = array<i64: 3, 1>}, {transform_indices = @transform_5, window_bounds = array<i64: 8, 128>}]} {
    %c0 = arith.constant 0 : index
    %c0_0 = arith.constant 0 : index
    %0 = vector.load %arg1[%c0, %c0_0] : memref<11x128xf32, #tpu.memory_space<vmem>>, vector<11x128xf32>
    %1 = vector.extract_strided_slice %0 {offsets = [0, 0], sizes = [8, 128], strides = [1, 1]} : vector<11x128xf32> to vector<8x128xf32>
    %cst = arith.constant 1.000000e+00 : f32
    %2 = vector.broadcast %cst : f32 to vector<8x128xf32>
    %3 = arith.mulf %1, %2 : vector<8x128xf32>
    %cst_1 = arith.constant 2.000000e+00 : f32
    %4 = vector.broadcast %cst_1 : f32 to vector<8x128xf32>
    %5 = arith.mulf %1, %4 : vector<8x128xf32>
    %cst_2 = arith.constant 4.000000e+00 : f32
    %6 = vector.broadcast %cst_2 : f32 to vector<8x128xf32>
    %7 = arith.mulf %1, %6 : vector<8x128xf32>
    %cst_3 = arith.constant 8.000000e+00 : f32
    %8 = vector.broadcast %cst_3 : f32 to vector<8x128xf32>
    %9 = arith.mulf %1, %8 : vector<8x128xf32>
    %cst_4 = arith.constant 1.600000e+01 : f32
    %10 = vector.broadcast %cst_4 : f32 to vector<8x128xf32>
    %11 = arith.mulf %1, %10 : vector<8x128xf32>
    %cst_5 = arith.constant 3.200000e+01 : f32
    %12 = vector.broadcast %cst_5 : f32 to vector<8x128xf32>
    %13 = arith.mulf %1, %12 : vector<8x128xf32>
    %14 = tpu.concatenate %3, %5, %7, %9, %11, %13 in 0 : vector<8x128xf32>, vector<8x128xf32>, vector<8x128xf32>, vector<8x128xf32>, vector<8x128xf32>, vector<8x128xf32> -> vector<48x128xf32>
    %15 = math.sin %14 : vector<48x128xf32>
    %16 = math.cos %14 : vector<48x128xf32>
    %17 = tpu.concatenate %15, %16 in 0 : vector<48x128xf32>, vector<48x128xf32> -> vector<96x128xf32>
    %18 = tpu.concatenate %17, %0 in 0 : vector<96x128xf32>, vector<11x128xf32> -> vector<107x128xf32>
    %c0_6 = arith.constant 0 : index
    %c0_7 = arith.constant 0 : index
    %19 = vector.load %arg2[%c0_6, %c0_7] : memref<32x107xf32, #tpu.memory_space<vmem>>, vector<32x107xf32>
    %cst_8 = arith.constant dense<0.000000e+00> : vector<32x128xf32>
    %20 = tpu.matmul %19, %18, %cst_8 {dimension_numbers = #tpu.dot_dimension_numbers<[1], [0], [0], [1], [0, 0, 1, 1], [], []>} : vector<32x107xf32>, vector<107x128xf32>, vector<32x128xf32> -> vector<32x128xf32>
    %c0_9 = arith.constant 0 : index
    %c0_10 = arith.constant 0 : index
    %21 = vector.load %arg3[%c0_9, %c0_10] : memref<32x1xf32, #tpu.memory_space<vmem>>, vector<32x1xf32>
    %22 = vector.broadcast %21 : vector<32x1xf32> to vector<32x128xf32>
    %23 = arith.addf %20, %22 : vector<32x128xf32>
    %cst_11 = arith.constant 0.000000e+00 : f32
    %24 = vector.broadcast %cst_11 : f32 to vector<32x128xf32>
    %25 = arith.maximumf %23, %24 : vector<32x128xf32>
    %c0_12 = arith.constant 0 : index
    %c0_13 = arith.constant 0 : index
    %26 = vector.load %arg4[%c0_12, %c0_13] : memref<3x32xf32, #tpu.memory_space<vmem>>, vector<3x32xf32>
    %cst_14 = arith.constant dense<0.000000e+00> : vector<3x128xf32>
    %27 = tpu.matmul %26, %25, %cst_14 {dimension_numbers = #tpu.dot_dimension_numbers<[1], [0], [0], [1], [0, 0, 1, 1], [], []>} : vector<3x32xf32>, vector<32x128xf32>, vector<3x128xf32> -> vector<3x128xf32>
    %c0_15 = arith.constant 0 : index
    %c0_16 = arith.constant 0 : index
    %28 = vector.load %arg5[%c0_15, %c0_16] : memref<3x1xf32, #tpu.memory_space<vmem>>, vector<3x1xf32>
    %29 = vector.broadcast %28 : vector<3x1xf32> to vector<3x128xf32>
    %30 = arith.addf %27, %29 : vector<3x128xf32>
    %31 = vector.extract_strided_slice %30 {offsets = [2, 0], sizes = [1, 128], strides = [1, 1]} : vector<3x128xf32> to vector<1x128xf32>
    %cst_17 = arith.constant 1.09861231 : f32
    %32 = vector.broadcast %cst_17 : f32 to vector<3x128xf32>
    %33 = arith.subf %30, %32 : vector<3x128xf32>
    %cst_18 = arith.constant -1.000000e+01 : f32
    %cst_19 = arith.constant 1.000000e+01 : f32
    %34 = vector.broadcast %cst_18 : f32 to vector<3x128xf32>
    %35 = arith.maximumf %34, %30 : vector<3x128xf32>
    %36 = vector.broadcast %cst_19 : f32 to vector<3x128xf32>
    %37 = arith.minimumf %36, %35 : vector<3x128xf32>
    %cst_20 = arith.constant 2.000000e+00 : f32
    %38 = vector.broadcast %cst_20 : f32 to vector<1x128xf32>
    %39 = arith.subf %31, %38 : vector<1x128xf32>
    %cst_21 = arith.constant 1.000000e+00 : f32
    %40 = vector.broadcast %cst_21 : f32 to vector<1x128xf32>
    %41 = arith.subf %31, %40 : vector<1x128xf32>
    %42 = tpu.concatenate %33, %37, %39, %41 in 0 : vector<3x128xf32>, vector<3x128xf32>, vector<1x128xf32>, vector<1x128xf32> -> vector<8x128xf32>
    %cst_22 = arith.constant 0.000000e+00 : f32
    %43 = vector.broadcast %cst_22 : f32 to vector<8x128xf32>
    %44 = arith.subf %43, %42 : vector<8x128xf32>
    %45 = math.exp %44 : vector<8x128xf32>
    %cst_23 = arith.constant 1.000000e+00 : f32
    %46 = vector.broadcast %cst_23 : f32 to vector<8x128xf32>
    %47 = arith.addf %46, %45 : vector<8x128xf32>
    %cst_24 = arith.constant 1.000000e+00 : f32
    %48 = vector.broadcast %cst_24 : f32 to vector<8x128xf32>
    %49 = arith.divf %48, %47 : vector<8x128xf32>
    %50 = tpu.iota {dimensions = array<i32: 0>} : vector<8x1xi32>
    %c7_i32 = arith.constant 7 : i32
    %51 = vector.broadcast %c7_i32 : i32 to vector<8x1xi32>
    %52 = arith.cmpi eq, %50, %51 : vector<8x1xi32>
    %cst_25 = arith.constant 0.00999999977 : f32
    %cst_26 = arith.constant 0.000000e+00 : f32
    %53 = vector.broadcast %cst_25 : f32 to vector<8x1xf32>
    %54 = vector.broadcast %cst_26 : f32 to vector<8x1xf32>
    %55 = arith.select %52, %53, %54 : vector<8x1xi1>, vector<8x1xf32>
    %56 = vector.broadcast %55 : vector<8x1xf32> to vector<8x128xf32>
    %57 = arith.maximumf %49, %56 : vector<8x128xf32>
    %c0_27 = arith.constant 0 : index
    %c0_28 = arith.constant 0 : index
    %58 = vector.load %arg6[%c0_27, %c0_28] : memref<8x128xf32, #tpu.memory_space<vmem>>, vector<8x128xf32>
    tpu.vector_store %arg6[%c0_27, %c0_28], %57 {strides = array<i32>} : memref<8x128xf32, #tpu.memory_space<vmem>>, vector<8x128xf32>,
    return
  }
  func.func @transform_0(%arg0: i32) -> (i32, i32) {
    %c0_i32 = arith.constant 0 : i32
    %c0_i32_0 = arith.constant 0 : i32
    return %c0_i32, %arg0 : i32, i32
  }
  func.func @transform_1(%arg0: i32) -> (i32, i32) {
    %c0_i32 = arith.constant 0 : i32
    %c0_i32_0 = arith.constant 0 : i32
    %c0_i32_1 = arith.constant 0 : i32
    return %c0_i32, %c0_i32_0 : i32, i32
  }
  func.func @transform_2(%arg0: i32) -> (i32, i32) {
    %c0_i32 = arith.constant 0 : i32
    %c0_i32_0 = arith.constant 0 : i32
    %c0_i32_1 = arith.constant 0 : i32
    return %c0_i32, %c0_i32_0 : i32, i32
  }
  func.func @transform_3(%arg0: i32) -> (i32, i32) {
    %c0_i32 = arith.constant 0 : i32
    %c0_i32_0 = arith.constant 0 : i32
    %c0_i32_1 = arith.constant 0 : i32
    return %c0_i32, %c0_i32_0 : i32, i32
  }
  func.func @transform_4(%arg0: i32) -> (i32, i32) {
    %c0_i32 = arith.constant 0 : i32
    %c0_i32_0 = arith.constant 0 : i32
    %c0_i32_1 = arith.constant 0 : i32
    return %c0_i32, %c0_i32_0 : i32, i32
  }
  func.func @transform_5(%arg0: i32) -> (i32, i32) {
    %c0_i32 = arith.constant 0 : i32
    %c0_i32_0 = arith.constant 0 : i32
    return %c0_i32, %arg0 : i32, i32
  }
}

</mosaic_0001>

<bundles_post_ra>
// kernel: tpu_custom_call.1
= control target key start
LH: loop header
LB: loop body
LE: loop exit
PB: predicated region body
PF: predicated region fallthrough
CT: control target
= control target key end

     0   :  { %10 = vsyncpa [#allocation3], 0  ;;  %s2489_s0 = inlined_call_operand.hbm [shape: f32[11,128], index: 0, kind: input, shape index: {}]   ;;  %s2490_s1 = inlined_call_operand.vmem [shape: f32[32,107], index: 1, kind: input, shape index: {}]   ;;  %s2491_s2 = inlined_call_operand.vmem [shape: f32[32,1], index: 2, kind: input, shape index: {}]   ;;  %s2492_s3 = inlined_call_operand.vmem [shape: f32[3,32], index: 3, kind: input, shape index: {}]   ;;  %s2493_s4 = inlined_call_operand.vmem [shape: f32[3,1], index: 4, kind: input, shape index: {}]   ;;  %s2494_s5 = inlined_call_operand.hbm [shape: f32[8,128], index: 5, kind: output, shape index: {}]  }
   0x1   :  { %11 = vsyncpa [#allocation4], 0  ;;  %s1825_s18 = smov [#allocation2]   ;;  %s1777_s22 = scalar_lea.hbm %s2489_s0, 256 }
   0x2   :  { %s17_s19 = sshll.u32 %s1825_s18, 4  ;;  %p1778_p0 = scmp.ne.s32.totalorder %s2489_s0, %s1777_s22  ;;  %s18_s19 = int_to_ptr.vmem [resolvable:$true] %s17_s19 }
   0x3   :  { %p1781_p1 = scmp.lt.u32.totalorder %s1777_s22, %s2489_s0 }
   0x5   :  { %p1783_p2 = pnand %p1781_p1, %p1778_p0 }
   0x7   :  { %1786 = shalt.err (!%p1783_p2)
}
   0x8   :  { %s1787_s27 = scalar_lea.vmem %s18_s19, 256  ;;  %p1792_p4 = scmp.lt.s32.totalorder %s18_s19, %s18_s19 }
   0x9   :  { %p1788_p3 = scmp.ne.s32.totalorder %s18_s19, %s1787_s27  ;;  %p1793_p5 = scmp.lt.s32.totalorder %s1787_s27, %s1787_s27 }
   0xb   :  { %p1794_p6 = por %p1793_p5, %p1792_p4 }
   0xd   :  { %p1795_p7 = pnand %p1794_p6, %p1788_p3 }
   0xf   :  { %1798 = shalt.err (!%p1795_p7)
}
  0x10   :  { %s1826_s28 = smov 128   ;;  %s1827_s29 = smov 8  }
  0x11   :  { %23 = dma.hbm_to_vmem [thread:$0]  %s2489_s0, 256, %s18_s19, [#allocation3], %s1826_s28, %s1826_s28, %s1827_s29  }
  0x12   :  { %1821 = dma.done.wait [#allocation3], 256  }
  0x13   :  { %1822 = vsyncadd [#allocation3], 4294967040  ;;  %v1882_v0 = vld [vmem:[#allocation2] sm:$0xff]  ;;  %v1828_v27 = vmov 683565275  }
  0x14   :  { %v1885_v1 = vmul.f32 2.0, %v1882_v0  ;;  %v42_v2 = vand.u32 2147483647, %v1882_v0  ;;  %v45_v3 = vand.u32 2139095040, %v1882_v0  ;;  %v1890_v4 = vmul.f32 4.0, %v1882_v0 }
  0x15   :  { %v1900_v22 = vmul.f32 8.0, %v1882_v0  ;;  %v1829_v29 = vmov 2475754826   ;;  %v1830_v31 = vmov 2131351028   ;;  %vm44_vm13 = vcmp.lt.s32.totalorder %v1882_v0, 0 }
  0x16   :  { %v46_v5 = vshrl.u32 %v45_v3, 23  ;;  %v49_v6 = vand.u32 8388607, %v42_v2  ;;  %v146_v7 = vand.u32 2147483647, %v1885_v1  ;;  %v149_v8 = vand.u32 2139095040, %v1885_v1 }
  0x17   :  { %v253_v10 = vand.u32 2139095040, %v1890_v4  ;;  %v1831_v33 = vmov 2102212464   ;;  %v1832_v35 = vmov 920167782  }
  0x18   :  { %v1545_v9 = vadd.s32 4294967169, %v46_v5  ;;  %v150_v11 = vshrl.u32 %v149_v8, 23  ;;  %v153_v12 = vand.u32 8388607, %v146_v7  ;;  %v50_v14 = vor.u32 8388608, %v49_v6 }
  0x19   :  { %v254_v17 = vshrl.u32 %v253_v10, 23  ;;  %v1833_v42 = vmov 1326507024   ;;  %vm1995_vm14 = vcmp.le.f32.partialorder %v42_v2, 0.7853982 }
  0x1a   :  { %v52_v13 = vadd.s32 1, %v1545_v9  ;;  %v1549_v15 = vadd.s32 4294967169, %v150_v11  ;;  %v154_v16 = vor.u32 8388608, %v153_v12  ;;  %v1902_v23 = vshll.u32 %v50_v14, 8 }
  0x1b   :  { %v1906_v25 = vadd.s32 4294967169, %v254_v17 }
  0x1c   :  { %vm53_vm0 = vcmp.gt.s32.totalorder %v52_v13, 0  ;;  %v156_v19 = vadd.s32 1, %v1549_v15  ;;  %v1904_v24 = vshll.u32 %v154_v16, 8 }
  0x1d   :  { %v54_v18 = vsel %vm53_vm0, %v52_v13, 0  ;;  %vm148_vm0 = vcmp.lt.s32.totalorder %v1885_v1, 0 }
  0x1e   :  { %v55_v20 = vshrl.u32 %v54_v18, 5  ;;  %v56_v21 = vand.u32 31, %v54_v18  ;;  %vm157_vm1 = vcmp.gt.s32.totalorder %v156_v19, 0 }
  0x1f   :  { %v158_v47 = vsel %vm157_vm1, %v156_v19, 0 }
  0x20   :  { %v57_v26 = vsub.s32 32, %v56_v21  ;;  %v59_v28 = vshll.u32 %v1828_v27, %v56_v21  ;;  %v62_v30 = vshll.u32 %v1829_v29, %v56_v21  ;;  %v65_v32 = vshll.u32 %v1830_v31, %v56_v21 }
  0x21   :  { %v68_v34 = vshll.u32 %v1831_v33, %v56_v21  ;;  %v71_v36 = vshll.u32 %v1832_v35, %v56_v21  ;;  %vm74_vm2 = vcmp.lt.s32.totalorder %v55_v20, 1  ;;  %vm75_vm3 = vcmp.lt.s32.totalorder %v55_v20, 2 }
  0x22   :  { %v58_v37 = vshrl.u32 %v1828_v27, %v57_v26  ;;  %v60_v38 = vshrl.u32 %v1829_v29, %v57_v26  ;;  %v63_v39 = vshrl.u32 %v1830_v31, %v57_v26  ;;  %v66_v40 = vshrl.u32 %v1831_v33, %v57_v26 }
  0x23   :  { %v69_v41 = vshrl.u32 %v1832_v35, %v57_v26  ;;  %v72_v43 = vshrl.u32 %v1833_v42, %v57_v26  ;;  %vm76_vm4 = vcmp.lt.s32.totalorder %v55_v20, 3  ;;  %vm77_vm5 = vcmp.lt.s32.totalorder %v55_v20, 4 }
  0x24   :  { %v61_v44 = vor.u32 %v60_v38, %v59_v28  ;;  %v64_v45 = vor.u32 %v63_v39, %v62_v30  ;;  %v67_v46 = vor.u32 %v66_v40, %v65_v32  ;;  %v159_v50 = vshrl.u32 %v158_v47, 5 }
  0x25   :  { %v70_v48 = vor.u32 %v69_v41, %v68_v34  ;;  %v73_v49 = vor.u32 %v72_v43, %v71_v36  ;;  %v160_v51 = vand.u32 31, %v158_v47  ;;  %v260_v32 = vadd.s32 1, %v1906_v25 }
  0x26   :  { %v78_v52 = vsel %vm74_vm2, %v58_v37, %v61_v44  ;;  %v79_v53 = vsel %vm77_vm5, %v67_v46, 2102212464  ;;  %v82_v54 = vsel %vm74_vm2, %v61_v44, %v64_v45  ;;  %v86_v55 = vsel %vm74_vm2, %v64_v45, %v67_v46 }
  0x27   :  { %v80_v56 = vsel %vm76_vm4, %v64_v45, %v79_v53  ;;  %v83_v57 = vsel %vm77_vm5, %v70_v48, 920167782  ;;  %v87_v58 = vsel %vm77_vm5, %v73_v49, 1326507024  ;;  %v161_v59 = vsub.s32 32, %v160_v51 }
  0x28   :  { %v81_v60 = vsel %vm75_vm3, %v78_v52, %v80_v56  ;;  %v84_v61 = vsel %vm76_vm4, %v67_v46, %v83_v57  ;;  %v88_v62 = vsel %vm76_vm4, %v70_v48, %v87_v58  ;;  %v163_v63 = vshll.u32 %v1828_v27, %v160_v51 }
  0x29   :  { %v85_v3 = vsel %vm75_vm3, %v82_v54, %v84_v61  ;;  %v89_v5 = vsel %vm75_vm3, %v86_v55, %v88_v62  ;;  %v97_v6 = vmul.u32 %v1902_v23, %v81_v60  ;;  %v162_v8 = vshrl.u32 %v1828_v27, %v161_v59 }
  0x2a   :  { %v1933_v9 = vmul.u32.u64.low %v1902_v23, %v89_v5  ;;  %v1934_v10 = vmul.u32.u64.high %v1902_v23, %v89_v5, %v1933_v9  ;;  %v1937_v11 = vmul.u32.u64.low %v1902_v23, %v85_v3  ;;  %v1938_v12 = vmul.u32.u64.high %v1902_v23, %v85_v3, %v1937_v11 }
  0x2b   :  { %v164_v13 = vshrl.u32 %v1829_v29, %v161_v59  ;;  %v166_v14 = vshll.u32 %v1829_v29, %v160_v51  ;;  %v167_v15 = vshrl.u32 %v1830_v31, %v161_v59  ;;  %v169_v16 = vshll.u32 %v1830_v31, %v160_v51 }
  0x2c   :  { %v170_v17 = vshrl.u32 %v1831_v33, %v161_v59  ;;  %v172_v18 = vshll.u32 %v1831_v33, %v160_v51  ;;  %v173_v19 = vshrl.u32 %v1832_v35, %v161_v59  ;;  %v175_v20 = vshll.u32 %v1832_v35, %v160_v51 }
  0x2d   :  { %v165_v21 = vor.u32 %v164_v13, %v163_v63  ;;  %v168_v23 = vor.u32 %v167_v15, %v166_v14  ;;  %v176_v26 = vshrl.u32 %v1833_v42, %v161_v59  ;;  %vm178_vm6 = vcmp.lt.s32.totalorder %v159_v50, 1 }
  0x2e   :  { %vm99_vm7 = vc.u32 %v1934_v10, %v1937_v11  ;;  %v100_v28 = vadd.s32 1, %v1938_v12  ;;  %v171_v30 = vor.u32 %v170_v17, %v169_v16  ;;  %v174_v34 = vor.u32 %v173_v19, %v172_v18 }
  0x2f   :  { %v177_v36 = vor.u32 %v176_v26, %v175_v20  ;;  %vm179_vm8 = vcmp.lt.s32.totalorder %v159_v50, 2  ;;  %vm180_vm9 = vcmp.lt.s32.totalorder %v159_v50, 3  ;;  %vm181_vm10 = vcmp.lt.s32.totalorder %v159_v50, 4 }
  0x30   :  { %v101_v37 = vsel %vm99_vm7, %v100_v28, %v1938_v12  ;;  %v182_v38 = vsel %vm178_vm6, %v162_v8, %v165_v21  ;;  %v186_v39 = vsel %vm178_vm6, %v165_v21, %v168_v23  ;;  %v183_v41 = vsel %vm181_vm10, %v171_v30, 2102212464 }
  0x31   :  { %v102_v40 = vadd.s32 %v101_v37, %v97_v6  ;;  %v187_v43 = vsel %vm181_vm10, %v174_v34, 920167782  ;;  %v190_v44 = vsel %vm178_vm6, %v168_v23, %v171_v30  ;;  %v184_v45 = vsel %vm180_vm9, %v168_v23, %v183_v41 }
  0x32   :  { %v188_v46 = vsel %vm180_vm9, %v171_v30, %v187_v43  ;;  %v191_v47 = vsel %vm181_vm10, %v177_v36, 1326507024  ;;  %vm261_vm11 = vcmp.gt.s32.totalorder %v260_v32, 0  ;;  %v250_v51 = vand.u32 2147483647, %v1890_v4 }
  0x33   :  { %v103_v25 = vadd.s32 536870912, %v102_v40  ;;  %v189_v48 = vsel %vm179_vm8, %v186_v39, %v188_v46  ;;  %v192_v49 = vsel %vm180_vm9, %v174_v34, %v191_v47  ;;  %v185_v52 = vsel %vm179_vm8, %v182_v38, %v184_v45 }
  0x34   :  { %v193_v53 = vsel %vm179_vm8, %v190_v44, %v192_v49  ;;  %v1963_v54 = vmul.u32.u64.low %v1904_v24, %v189_v48  ;;  %v1964_v55 = vmul.u32.u64.high %v1904_v24, %v189_v48, %v1963_v54  ;;  %v262_v59 = vsel %vm261_vm11, %v260_v32, 0 }
  0x35   :  { %v104_v56 = vshrl.u32 %v103_v25, 30  ;;  %v1967_v57 = vmul.u32.u64.low %v1904_v24, %v193_v53  ;;  %v1968_v58 = vmul.u32.u64.high %v1904_v24, %v193_v53, %v1967_v57  ;;  %v264_v60 = vand.u32 31, %v262_v59 }
  0x36   :  { %v201_v62 = vmul.u32 %v1904_v24, %v185_v52  ;;  %v204_v63 = vadd.s32 1, %v1964_v55  ;;  %v257_v50 = vand.u32 8388607, %v250_v51  ;;  %v357_v5 = vand.u32 2139095040, %v1900_v22 }
  0x37   :  { %v105_v61 = vshll.u32 %v104_v56, 30  ;;  %vm203_vm12 = vc.u32 %v1968_v58, %v1963_v54  ;;  %v265_v8 = vsub.s32 32, %v264_v60  ;;  %v354_v14 = vand.u32 2147483647, %v1900_v22 }
  0x38   :  { %v205_v6 = vsel %vm203_vm12, %v204_v63, %v1964_v55  ;;  %v258_v13 = vor.u32 8388608, %v257_v50  ;;  %v358_v16 = vshrl.u32 %v357_v5, 23  ;;  %v128_v17 = vsub.s32 4, %v104_v56 }
  0x39   :  { %v106_v3 = vsub.s32 %v102_v40, %v105_v61  ;;  %v206_v12 = vadd.s32 %v205_v6, %v201_v62  ;;  %v267_v18 = vshll.u32 %v1828_v27, %v264_v60  ;;  %v268_v19 = vshrl.u32 %v1829_v29, %v265_v8 }
  0x3a   :  { %v270_v20 = vshll.u32 %v1829_v29, %v264_v60  ;;  %v271_v23 = vshrl.u32 %v1830_v31, %v265_v8  ;;  %v273_v26 = vshll.u32 %v1830_v31, %v264_v60  ;;  %v274_v28 = vshrl.u32 %v1831_v33, %v265_v8 }
  0x3b   :  { %v108_v9 = vsub.s32 0, %v106_v3  ;;  %v207_v15 = vadd.s32 536870912, %v206_v12  ;;  %v98_v30 = vadd.s32 %v1937_v11, %v1934_v10  ;;  %v1987_v34 = vshll.u32 %v258_v13, 8 }
  0x3c   :  { %v1991_v36 = vand.u32 8388607, %v354_v14  ;;  %v263_v39 = vshrl.u32 %v262_v59, 5  ;;  %v276_v40 = vshll.u32 %v1831_v33, %v264_v60  ;;  %v277_v41 = vshrl.u32 %v1832_v35, %v265_v8 }
  0x3d   :  { %v1546_v24 = vmin.u32 %v108_v9, %v106_v3  ;;  %v208_v32 = vshrl.u32 %v207_v15, 30  ;;  %v129_v10 = vsel %vm44_vm13, %v128_v17, %v104_v56  ;;  %v2004_v11 = vadd.s32 %v1963_v54, %v1968_v58 }
  0x3e   :  { %v1557_v44 = vadd.s32 4294967169, %v358_v16  ;;  %v269_v2 = vor.u32 %v268_v19, %v267_v18  ;;  %v272_v45 = vor.u32 %v271_v23, %v270_v20  ;;  %v275_v46 = vor.u32 %v274_v28, %v273_v26 }
  0x3f   :  { %v110_v21 = vclz %v1546_v24  ;;  %v209_v43 = vshll.u32 %v208_v32, 30  ;;  %v279_v48 = vshll.u32 %v1832_v35, %v264_v60  ;;  %v280_v49 = vshrl.u32 %v1833_v42, %v265_v8 }
  0x40   :  { %v278_v54 = vor.u32 %v277_v41, %v276_v40  ;;  %v266_v57 = vshrl.u32 %v1828_v27, %v265_v8  ;;  %vm282_vm1 = vcmp.lt.s32.totalorder %v263_v39, 1  ;;  %vm285_vm2 = vcmp.lt.s32.totalorder %v263_v39, 4 }
  0x41   :  { %v1547_v38 = vadd.s32 4294967294, %v110_v21  ;;  %v2007_v25 = vsub.s32 %v206_v12, %v209_v43  ;;  %vm283_vm3 = vcmp.lt.s32.totalorder %v263_v39, 2  ;;  %v287_v61 = vsel %vm285_vm2, %v275_v46, 2102212464 }
  0x42   :  { %v232_v60 = vsub.s32 4, %v208_v32  ;;  %v281_v63 = vor.u32 %v280_v49, %v279_v48  ;;  %vm284_vm4 = vcmp.lt.s32.totalorder %v263_v39, 3  ;;  %v290_v5 = vsel %vm282_vm1, %v269_v2, %v272_v45 }
  0x43   :  { %vm1548_vm15 = vcmp.lt.s32.totalorder %v1547_v38, 0  ;;  %v212_v56 = vsub.s32 0, %v2007_v25  ;;  %v291_v6 = vsel %vm285_vm2, %v278_v54, 920167782  ;;  %v131_v8 = vsel %vm1995_vm14, 0, %v129_v10 }
  0x44   :  { %v113_v47 = vsel %vm1548_vm15, 0, %v1547_v38  ;;  %vm2021_vm5 = vcmp.le.f32.partialorder %v146_v7, 0.7853982  ;;  %v286_v13 = vsel %vm282_vm1, %v266_v57, %v269_v2  ;;  %v288_v24 = vsel %vm284_vm4, %v272_v45, %v287_v61 }
  0x45   :  { %v114_v52 = vsub.s32 32, %v113_v47  ;;  %v115_v53 = vshll.u32 %v106_v3, %v113_v47  ;;  %v118_v55 = vsub.s32 4294967266, %v113_v47  ;;  %v1550_v62 = vmin.u32 %v212_v56, %v2007_v25 }
  0x46   :  { %v292_v17 = vsel %vm284_vm4, %v275_v46, %v291_v6  ;;  %v294_v18 = vsel %vm282_vm1, %v272_v45, %v275_v46  ;;  %v233_v20 = vsel %vm148_vm0, %v232_v60, %v208_v32  ;;  %v295_v21 = vsel %vm285_vm2, %v281_v63, 1326507024 }
  0x47   :  { %v116_v58 = vshrl.u32 %v98_v30, %v114_v52  ;;  %v119_v59 = vadd.s32 127, %v118_v55  ;;  %v214_v12 = vclz %v1550_v62  ;;  %v293_v7 = vsel %vm283_vm3, %v290_v5, %v292_v17 }
  0x48   :  { %v296_v26 = vsel %vm284_vm4, %v278_v54, %v295_v21  ;;  %v2035_v28 = vmul.u32.u64.low %v1987_v34, %v293_v7  ;;  %v2036_v30 = vmul.u32.u64.high %v1987_v34, %v293_v7, %v2035_v28  ;;  %v289_v38 = vsel %vm283_vm3, %v286_v13, %v288_v24 }
  0x49   :  { %v117_v50 = vor.u32 %v116_v58, %v115_v53  ;;  %v120_v3 = vshll.u32 %v119_v59, 23  ;;  %v1551_v19 = vadd.s32 4294967294, %v214_v12  ;;  %v297_v40 = vsel %vm283_vm3, %v294_v18, %v296_v26 }
  0x4a   :  { %v364_v41 = vadd.s32 1, %v1557_v44  ;;  %v2042_v43 = vmul.u32.u64.low %v1987_v34, %v297_v40  ;;  %v2043_v2 = vmul.u32.u64.high %v1987_v34, %v297_v40, %v2042_v43  ;;  %v305_v49 = vmul.u32 %v1987_v34, %v289_v38 }
  0x4b   :  { %v121_v15 = vor.u32 4788187, %v120_v3  ;;  %v124_v16 = vcvt.s32.f32 %v117_v50  ;;  %vm1552_vm6 = vcmp.lt.s32.totalorder %v1551_v19, 0  ;;  %v308_v52 = vadd.s32 1, %v2036_v30 }
  0x4c   :  { %v217_v32 = vsel %vm1552_vm6, 0, %v1551_v19  ;;  %vm365_vm7 = vcmp.gt.s32.totalorder %v364_v41, 0  ;;  %v135_v39 = vadd.s32 3, %v131_v8  ;;  %v235_v57 = vsel %vm2021_vm5, 0, %v233_v20 }
  0x4d   :  { %v122_v23 = vand.u32 2147483647, %v121_v15  ;;  %v218_v45 = vsub.s32 32, %v217_v32  ;;  %v219_v46 = vshll.u32 %v2007_v25, %v217_v32  ;;  %v222_v47 = vsub.s32 4294967266, %v217_v32 }
  0x4e   :  { %v366_v53 = vsel %vm365_vm7, %v364_v41, 0  ;;  %v2053_v25 = vand.u32 3, %v131_v8  ;;  %vm307_vm8 = vc.u32 %v2043_v2, %v2035_v28  ;;  %v2062_v60 = vmul.f32 16.0, %v1882_v0 }
  0x4f   :  { %v125_v10 = vmul.f32 %v124_v16, %v122_v23  ;;  %v220_v44 = vshrl.u32 %v2004_v11, %v218_v45  ;;  %v223_v55 = vadd.s32 127, %v222_v47  ;;  %v368_v54 = vand.u32 31, %v366_v53 }
  0x50   :  { %v309_v11 = vsel %vm307_vm8, %v308_v52, %v2036_v30  ;;  %v2064_v63 = vand.u32 3, %v135_v39  ;;  %v239_v5 = vadd.s32 3, %v235_v57  ;;  %vm764_vm9 = vcmp.eq.s32.totalorder %v2053_v25, 2 }
  0x51   :  { %v126_v48 = vxor.u32 2147483648, %v125_v10  ;;  %v221_v58 = vor.u32 %v220_v44, %v219_v46  ;;  %v224_v59 = vshll.u32 %v223_v55, 23  ;;  %v310_v61 = vadd.s32 %v309_v11, %v305_v49 }
  0x52   :  { %v369_v62 = vsub.s32 32, %v368_v54  ;;  %v362_v6 = vor.u32 8388608, %v1991_v36  ;;  %vm761_vm10 = vcmp.eq.s32.totalorder %v2053_v25, 0  ;;  %v2069_v12 = vshrl.u32 %v366_v53, 5 }
  0x53   :  { %v127_v56 = vsel %vm44_vm13, %v126_v48, %v125_v10  ;;  %v225_v50 = vor.u32 4788187, %v224_v59  ;;  %v228_v3 = vcvt.s32.f32 %v221_v58  ;;  %v311_v37 = vadd.s32 536870912, %v310_v61 }
  0x54   :  { %v130_v34 = vsel %vm1995_vm14, %v1882_v0, %v127_v56  ;;  %v371_v13 = vshll.u32 %v1828_v27, %v368_v54  ;;  %v380_v24 = vshll.u32 %v1831_v33, %v368_v54  ;;  %vm760_vm11 = vcmp.lt.s32.totalorder %v2053_v25, 2 }
  0x55   :  { %1748 = vcosq.f32 %v130_v34  ;;  %v226_v8 = vand.u32 2147483647, %v225_v50  ;;  %v2074_v15 = vshrl.u32 %v311_v37, 30  ;;  %v372_v16 = vshrl.u32 %v1829_v29, %v369_v62 }
  0x56   :  { %1750 = vsinq.f32 %v130_v34  ;;  %v374_v17 = vshll.u32 %v1829_v29, %v368_v54  ;;  %v381_v18 = vshrl.u32 %v1832_v35, %v369_v62  ;;  %vm138_vm12 = vcmp.eq.s32.totalorder %v2064_v63, 0 }
  0x57   :  { %v229_v36 = vmul.f32 %v228_v3, %v226_v8  ;;  %v375_v19 = vshrl.u32 %v1830_v31, %v369_v62  ;;  %v377_v20 = vshll.u32 %v1830_v31, %v368_v54  ;;  %v378_v7 = vshrl.u32 %v1831_v33, %v369_v62 }
  0x58   :  { %vm141_vm13 = vcmp.eq.s32.totalorder %v2064_v63, 2  ;;  %v2084_v21 = vand.u32 3, %v239_v5  ;;  %v2086_v23 = vand.u32 3, %v235_v57  ;;  %v313_v26 = vshll.u32 %v2074_v15, 30 }
  0x59   :  { %vm134_vm14 = vweird.f32 %v1882_v0  ;;  %v230_v30 = vxor.u32 2147483648, %v229_v36  ;;  %v382_v38 = vor.u32 %v381_v18, %v380_v24  ;;  %v383_v40 = vshll.u32 %v1832_v35, %v368_v54 }
  0x5a   :  { %v384_v41 = vshrl.u32 %v1833_v42, %v369_v62  ;;  %vm137_vm15 = vcmp.lt.s32.totalorder %v2064_v63, 2  ;;  %v2093_v10 = vsub.s32 %v310_v61, %v313_v26  ;;  %v370_v32 = vshrl.u32 %v1828_v27, %v369_v62 }
  0x5b   :  { %vm389_vm1 = vcmp.lt.s32.totalorder %v2069_v12, 4  ;;  %v2097_v43 = vshll.u32 %v362_v6, 8  ;;  %v231_v45 = vsel %vm148_vm0, %v230_v30, %v229_v36  ;;  %v373_v46 = vor.u32 %v372_v16, %v371_v13 }
  0x5c   :  { %v376_v47 = vor.u32 %v375_v19, %v374_v17  ;;  %v379_v48 = vor.u32 %v378_v7, %v377_v20  ;;  %v234_v52 = vsel %vm2021_vm5, %v1885_v1, %v231_v45  ;;  %v316_v53 = vsub.s32 0, %v2093_v10 }
  0x5d   :  { %vm386_vm2 = vcmp.lt.s32.totalorder %v2069_v12, 1  ;;  %vm388_vm3 = vcmp.lt.s32.totalorder %v2069_v12, 3  ;;  %1752 = vcosq.f32 %v234_v52  ;;  %v385_v55 = vor.u32 %v384_v41, %v383_v40 }
  0x5e   :  { %v395_v54 = vsel %vm389_vm1, %v382_v38, 920167782  ;;  %1754 = vsinq.f32 %v234_v52  ;;  %v1554_v57 = vmin.u32 %v316_v53, %v2093_v10  ;;  %v391_v9 = vsel %vm389_vm1, %v379_v48, 2102212464 }
  0x5f   :  { %v1749_v49 = vpop.eup %1748  ;;  %vm867_vm0 = vcmp.eq.s32.totalorder %v2086_v23, 2  ;;  %vm387_vm4 = vcmp.lt.s32.totalorder %v2069_v12, 2  ;;  %v394_v58 = vsel %vm386_vm2, %v373_v46, %v376_v47  ;;  %v396_v59 = vsel %vm388_vm3, %v379_v48, %v395_v54 }
  0x60   :  { %v1751_v39 = vpop.eup %1750  ;;  %v142_v44 = vxor.u32 2147483648, %v1749_v49  ;;  %vm242_vm5 = vcmp.eq.s32.totalorder %v2084_v21, 0  ;;  %vm864_vm6 = vcmp.eq.s32.totalorder %v2086_v23, 0  ;;  %v318_v61 = vclz %v1554_v57 }
  0x61   :  { %v139_v56 = vxor.u32 2147483648, %v1751_v39  ;;  %v390_v62 = vsel %vm386_vm2, %v370_v32, %v373_v46  ;;  %vm241_vm7 = vcmp.lt.s32.totalorder %v2084_v21, 2  ;;  %vm863_vm8 = vcmp.lt.s32.totalorder %v2086_v23, 2 }
  0x62   :  { %v766_v34 = vsel %vm764_vm9, %v142_v44, %v1751_v39  ;;  %v143_v50 = vsel %vm141_vm13, %v142_v44, %v1751_v39  ;;  %v392_v5 = vsel %vm388_vm3, %v376_v47, %v391_v9  ;;  %v398_v37 = vsel %vm386_vm2, %v376_v47, %v379_v48 }
  0x63   :  { %v763_v11 = vsel %vm761_vm10, %v1749_v49, %v139_v56  ;;  %v140_v6 = vsel %vm138_vm12, %v1749_v49, %v139_v56  ;;  %vm238_vm9 = vweird.f32 %v1885_v1  ;;  %v1555_v13 = vadd.s32 4294967294, %v318_v61 }
  0x64   :  { %v767_v3 = vsel %vm760_vm11, %v763_v11, %v766_v34  ;;  %v397_v25 = vsel %vm387_vm4, %v394_v58, %v396_v59  ;;  %vm245_vm10 = vcmp.eq.s32.totalorder %v2084_v21, 2  ;;  %v399_v24 = vsel %vm389_vm1, %v385_v55, 1326507024 }
  0x65   :  { %v768_v8 = vsel %vm134_vm14, nan, %v767_v3  ;;  %v2147_v16 = vmul.u32.u64.low %v2097_v43, %v397_v25  ;;  %v2148_v17 = vmul.u32.u64.high %v2097_v43, %v397_v25, %v2147_v16  ;;  %v306_v18 = vadd.s32 %v2035_v28, %v2043_v2 }
  0x66   :  { %vm1556_vm11 = vcmp.lt.s32.totalorder %v1555_v13, 0  ;;  %v400_v36 = vsel %vm388_vm3, %v382_v38, %v399_v24  ;;  %v461_v19 = vand.u32 2139095040, %v2062_v60  ;;  %v144_v20 = vsel %vm137_vm15, %v140_v6, %v143_v50 }
  0x67   :  { %v321_v7 = vsel %vm1556_vm11, 0, %v1555_v13  ;;  %v393_v26 = vsel %vm387_vm4, %v390_v62, %v392_v5  ;;  %v401_v30 = vsel %vm387_vm4, %v398_v37, %v400_v36  ;;  %v1753_v32 = vpop.eup %1752  ;;  %v336_v38 = vsub.s32 4, %v2074_v15 }
  0x68   :  { %v322_v40 = vsub.s32 32, %v321_v7  ;;  %v323_v41 = vshll.u32 %v2093_v10, %v321_v7  ;;  %v326_v28 = vsub.s32 4294967266, %v321_v7  ;;  %v462_v2 = vshrl.u32 %v461_v19, 23  ;;  %v1755_v47 = vpop.eup %1754 }
  0x69   :  { %v2165_v45 = vmul.u32.u64.low %v2097_v43, %v401_v30  ;;  %v2166_v46 = vmul.u32.u64.high %v2097_v43, %v401_v30, %v2165_v45  ;;  %v458_v63 = vand.u32 2147483647, %v2062_v60  ;;  %v145_v48 = vsel %vm134_vm14, nan, %v144_v20 }
  0x6a   :  { %v246_v12 = vxor.u32 2147483648, %v1753_v32  ;;  %v324_v49 = vshrl.u32 %v306_v18, %v322_v40  ;;  %v327_v52 = vadd.s32 127, %v326_v28  ;;  %v243_v53 = vxor.u32 2147483648, %v1755_v47 }
  0x6b   :  { %v409_v10 = vmul.u32 %v2097_v43, %v393_v26  ;;  %v412_v39 = vadd.s32 1, %v2148_v17  ;;  %v1561_v44 = vadd.s32 4294967169, %v462_v2  ;;  %vm411_vm12 = vc.u32 %v2166_v46, %v2147_v16 }
  0x6c   :  { %v247_v55 = vsel %vm245_vm10, %v246_v12, %v1755_v47  ;;  %v869_v54 = vsel %vm867_vm0, %v246_v12, %v1755_v47  ;;  %v325_v56 = vor.u32 %v324_v49, %v323_v41  ;;  %v328_v57 = vshll.u32 %v327_v52, 23 }
  0x6d   :  { %v244_v9 = vsel %vm242_vm5, %v1753_v32, %v243_v53  ;;  %v866_v34 = vsel %vm864_vm6, %v1753_v32, %v243_v53  ;;  %v465_v43 = vand.u32 8388607, %v458_v63  ;;  %v413_v3 = vsel %vm411_vm12, %v412_v39, %v2148_v17 }
  0x6e   :  { %v248_v58 = vsel %vm241_vm7, %v244_v9, %v247_v55  ;;  %v870_v59 = vsel %vm863_vm8, %v866_v34, %v869_v54  ;;  %v329_v11 = vor.u32 4788187, %v328_v57  ;;  %v332_v61 = vcvt.s32.f32 %v325_v56 }
  0x6f   :  { %v249_v62 = vsel %vm238_vm9, nan, %v248_v58  ;;  %v871_v50 = vsel %vm238_vm9, nan, %v870_v59  ;;  %v468_v5 = vadd.s32 1, %v1561_v44  ;;  %vm252_vm13 = vcmp.lt.s32.totalorder %v1890_v4, 0 }
  0x70   :  { %v1671_v37 = vpack.c.bf16 %v249_v62, %v145_v48  ;;  %v330_v6 = vand.u32 2147483647, %v329_v11  ;;  %v414_v21 = vadd.s32 %v413_v3, %v409_v10  ;;  %v337_v23 = vsel %vm252_vm13, %v336_v38, %v2074_v15 }
  0x71   :  { %v466_v13 = vor.u32 8388608, %v465_v43  ;;  %vm469_vm14 = vcmp.gt.s32.totalorder %v468_v5, 0  ;;  %v2198_v1 = vpack.c.bf16 %v871_v50, %v768_v8  ;;  %v2201_v17 = vmul.f32 32.0, %v1882_v0 }
  0x72   :  { %1672 = vmatprep.subr.bf16.mxu0 %v1671_v37  ;;  %v333_v25 = vmul.f32 %v332_v61, %v330_v6  ;;  %v415_v24 = vadd.s32 536870912, %v414_v21  ;;  %v470_v18 = vsel %vm469_vm14, %v468_v5, 0  ;;  %vm2205_vm15 = vcmp.le.f32.partialorder %v250_v51, 0.7853982 }
  0x73   :  { %1674 = vmatpush3.bf16.msra.mxu0 %v1671_v37  ;;  %v472_v36 = vand.u32 31, %v470_v18  ;;  %vm356_vm1 = vcmp.lt.s32.totalorder %v1900_v22, 0  ;;  %v2212_v7 = vsel %vm2205_vm15, 0, %v337_v23  ;;  %v2214_v26 = vshll.u32 %v466_v13, 8 }
  0x74   :  { %v334_v15 = vxor.u32 2147483648, %v333_v25  ;;  %v416_v20 = vshrl.u32 %v415_v24, 30  ;;  %v562_v0 = vand.u32 2147483647, %v2201_v17  ;;  %v471_v28 = vshrl.u32 %v470_v18, 5 }
  0x75   :  { %v473_v8 = vsub.s32 32, %v472_v36  ;;  %v475_v40 = vshll.u32 %v1828_v27, %v472_v36  ;;  %v478_v41 = vshll.u32 %v1829_v29, %v472_v36  ;;  %v481_v38 = vshll.u32 %v1830_v31, %v472_v36 }
  0x76   :  { %v335_v30 = vsel %vm252_vm13, %v334_v15, %v333_v25  ;;  %v417_v51 = vshll.u32 %v416_v20, 30  ;;  %v484_v48 = vshll.u32 %v1831_v33, %v472_v36  ;;  %v565_v12 = vand.u32 2139095040, %v2201_v17 }
  0x77   :  { %v476_v2 = vshrl.u32 %v1829_v29, %v473_v8  ;;  %v479_v32 = vshrl.u32 %v1830_v31, %v473_v8  ;;  %v482_v47 = vshrl.u32 %v1831_v33, %v473_v8  ;;  %v338_v49 = vsel %vm2205_vm15, %v1890_v4, %v335_v30 }
  0x78   :  { %v2224_v45 = vsub.s32 %v414_v21, %v417_v51  ;;  %vm2234_vm2 = vcmp.le.f32.partialorder %v354_v14, 0.7853982  ;;  %v410_v53 = vadd.s32 %v2147_v16, %v2166_v46  ;;  %v440_v10 = vsub.s32 4, %v416_v20 }
  0x79   :  { %v474_v39 = vshrl.u32 %v1828_v27, %v473_v8  ;;  %v477_v55 = vor.u32 %v476_v2, %v475_v40  ;;  %v480_v54 = vor.u32 %v479_v32, %v478_v41  ;;  %v485_v56 = vshrl.u32 %v1832_v35, %v473_v8 }
  0x7a   :  { %v420_v44 = vsub.s32 0, %v2224_v45  ;;  %v483_v57 = vor.u32 %v482_v47, %v481_v38  ;;  %v487_v9 = vshll.u32 %v1832_v35, %v472_v36  ;;  %v488_v14 = vshrl.u32 %v1833_v42, %v473_v8 }
  0x7b   :  { %vm490_vm3 = vcmp.lt.s32.totalorder %v471_v28, 1  ;;  %1756 = vcosq.f32 %v338_v49  ;;  %v486_v43 = vor.u32 %v485_v56, %v484_v48  ;;  %v566_v16 = vshrl.u32 %v565_v12, 23 }
  0x7c   :  { %v1558_v34 = vmin.u32 %v420_v44, %v2224_v45  ;;  %v441_v46 = vsel %vm356_vm1, %v440_v10, %v416_v20  ;;  %v489_v58 = vor.u32 %v488_v14, %v487_v9  ;;  %vm492_vm0 = vcmp.lt.s32.totalorder %v471_v28, 3 }
  0x7d   :  { %vm493_vm4 = vcmp.lt.s32.totalorder %v471_v28, 4  ;;  %vm491_vm5 = vcmp.lt.s32.totalorder %v471_v28, 2  ;;  %v494_v11 = vsel %vm490_vm3, %v474_v39, %v477_v55  ;;  %v498_v61 = vsel %vm490_vm3, %v477_v55, %v480_v54 }
  0x7e   :  { %v422_v59 = vclz %v1558_v34  ;;  %v495_v62 = vsel %vm493_vm4, %v483_v57, 2102212464  ;;  %v499_v50 = vsel %vm493_vm4, %v486_v43, 920167782  ;;  %v502_v3 = vsel %vm490_vm3, %v480_v54, %v483_v57 }
  0x7f   :  { %v503_v5 = vsel %vm493_vm4, %v489_v58, 1326507024  ;;  %v496_v6 = vsel %vm492_vm0, %v480_v54, %v495_v62  ;;  %v500_v21 = vsel %vm492_vm0, %v483_v57, %v499_v50  ;;  %1758 = vsinq.f32 %v338_v49 }
  0x80   :  { %v1559_v37 = vadd.s32 4294967294, %v422_v59  ;;  %v504_v23 = vsel %vm492_vm0, %v486_v43, %v503_v5  ;;  %v501_v13 = vsel %vm491_vm5, %v498_v61, %v500_v21  ;;  %v1565_v24 = vadd.s32 4294967169, %v566_v16 }
  0x81   :  { %v505_v25 = vsel %vm491_vm5, %v502_v3, %v504_v23  ;;  %v2252_v18 = vsel %vm2234_vm2, 0, %v441_v46  ;;  %v497_v20 = vsel %vm491_vm5, %v494_v11, %v496_v6  ;;  %v343_v51 = vadd.s32 3, %v2212_v7 }
  0x82   :  { %vm1560_vm6 = vcmp.lt.s32.totalorder %v1559_v37, 0  ;;  %v2255_v36 = vmul.u32.u64.low %v2214_v26, %v505_v25  ;;  %v2256_v19 = vmul.u32.u64.high %v2214_v26, %v505_v25, %v2255_v36  ;;  %v569_v32 = vand.u32 8388607, %v562_v0 }
  0x83   :  { %v425_v15 = vsel %vm1560_vm6, 0, %v1559_v37  ;;  %v2260_v8 = vmul.u32.u64.low %v2214_v26, %v501_v13  ;;  %v2261_v30 = vmul.u32.u64.high %v2214_v26, %v501_v13, %v2260_v8  ;;  %v572_v38 = vadd.s32 1, %v1565_v24 }
  0x84   :  { %v426_v40 = vsub.s32 32, %v425_v15  ;;  %v427_v41 = vshll.u32 %v2224_v45, %v425_v15  ;;  %v430_v2 = vsub.s32 4294967266, %v425_v15  ;;  %v447_v12 = vadd.s32 3, %v2252_v18 }
  0x85   :  { %v2268_v47 = vpop.eup %1756  ;;  %v513_v49 = vmul.u32 %v2214_v26, %v497_v20  ;;  %vm515_vm7 = vc.u32 %v2256_v19, %v2260_v8  ;;  %v516_v10 = vadd.s32 1, %v2261_v30  ;;  %vm573_vm8 = vcmp.gt.s32.totalorder %v572_v38, 0 }
  0x86   :  { %v428_v48 = vshrl.u32 %v410_v53, %v426_v40  ;;  %v431_v28 = vadd.s32 127, %v430_v2  ;;  %v2275_v45 = vand.u32 3, %v343_v51  ;;  %v574_v55 = vsel %vm573_vm8, %v572_v38, 0 }
  0x87   :  { %v517_v54 = vsel %vm515_vm7, %v516_v10, %v2261_v30  ;;  %v570_v56 = vor.u32 8388608, %v569_v32  ;;  %v576_v53 = vand.u32 31, %v574_v55  ;;  %v2279_v57 = vand.u32 3, %v2212_v7 }
  0x88   :  { %v429_v39 = vor.u32 %v428_v48, %v427_v41  ;;  %v432_v44 = vshll.u32 %v431_v28, 23  ;;  %v2281_v14 = vand.u32 3, %v447_v12  ;;  %v518_v34 = vadd.s32 %v517_v54, %v513_v49 }
  0x89   :  { %v2283_v43 = vpop.eup %1758  ;;  %v2285_v16 = vshrl.u32 %v574_v55, 5  ;;  %v577_v46 = vsub.s32 32, %v576_v53  ;;  %v579_v58 = vshll.u32 %v1828_v27, %v576_v53  ;;  %v582_v59 = vshll.u32 %v1829_v29, %v576_v53 }
  0x8a   :  { %v433_v9 = vor.u32 4788187, %v432_v44  ;;  %v436_v26 = vcvt.s32.f32 %v429_v39  ;;  %v519_v61 = vadd.s32 536870912, %v518_v34  ;;  %v585_v62 = vshll.u32 %v1830_v31, %v576_v53 }
  0x8b   :  { %v588_v7 = vshll.u32 %v1831_v33, %v576_v53  ;;  %vm346_vm9 = vcmp.eq.s32.totalorder %v2275_v45, 0  ;;  %vm349_vm10 = vcmp.eq.s32.totalorder %v2275_v45, 2  ;;  %v580_v50 = vshrl.u32 %v1829_v29, %v577_v46 }
  0x8c   :  { %v434_v11 = vand.u32 2147483647, %v433_v9  ;;  %v583_v3 = vshrl.u32 %v1830_v31, %v577_v46  ;;  %v586_v5 = vshrl.u32 %v1831_v33, %v577_v46  ;;  %v591_v37 = vshll.u32 %v1832_v35, %v576_v53 }
  0x8d   :  { %v2297_v21 = vshrl.u32 %v519_v61, 30  ;;  %v589_v23 = vshrl.u32 %v1832_v35, %v577_v46  ;;  %v592_v13 = vshrl.u32 %v1833_v42, %v577_v46  ;;  %v347_v25 = vxor.u32 2147483648, %v2283_v43 }
  0x8e   :  { %v437_v6 = vmul.f32 %v436_v26, %v434_v11  ;;  %v350_v24 = vxor.u32 2147483648, %v2268_v47  ;;  %v2303_v36 = vshll.u32 %v570_v56, 8  ;;  %vm966_vm11 = vcmp.lt.s32.totalorder %v2279_v57, 2 }
  0x8f   :  { %v521_v31 = vshll.u32 %v2297_v21, 30  ;;  %v581_v33 = vor.u32 %v580_v50, %v579_v58  ;;  %v584_v15 = vor.u32 %v583_v3, %v582_v59  ;;  %v578_v20 = vshrl.u32 %v1828_v27, %v577_v46 }
  0x90   :  { %v438_v29 = vxor.u32 2147483648, %v437_v6  ;;  %v587_v30 = vor.u32 %v586_v5, %v585_v62  ;;  %v590_v51 = vor.u32 %v589_v23, %v588_v7  ;;  %vm594_vm12 = vcmp.lt.s32.totalorder %v2285_v16, 1  ;;  %v1288_v62 = vld [vmem:[%s2491_s2] sm:$0xff]  ;;  %v1290_v7 = vld [vmem:[%s2491_s2 + $0x10] sm:$0xff] }
  0x91   :  { %vm345_vm13 = vcmp.lt.s32.totalorder %v2275_v45, 2  ;;  %v2312_v42 = vsub.s32 %v518_v34, %v521_v31  ;;  %v593_v40 = vor.u32 %v592_v13, %v591_v37  ;;  %vm597_vm14 = vcmp.lt.s32.totalorder %v2285_v16, 4 }
  0x92   :  { %v439_v35 = vsel %vm356_vm1, %v438_v29, %v437_v6  ;;  %vm596_vm15 = vcmp.lt.s32.totalorder %v2285_v16, 3  ;;  %v599_v27 = vsel %vm597_vm14, %v587_v30, 2102212464  ;;  %vm967_vm3 = vcmp.eq.s32.totalorder %v2279_v57, 0 }
  0x93   :  { %v442_v41 = vsel %vm2234_vm2, %v1900_v22, %v439_v35  ;;  %v524_v2 = vsub.s32 0, %v2312_v42  ;;  %vm595_vm1 = vcmp.lt.s32.totalorder %v2285_v16, 2  ;;  %v602_v32 = vsel %vm594_vm12, %v581_v33, %v584_v15  ;;  %v1284_v16 = vld [vmem:[%s2490_s1] sm:$0xff] }
  0x94   :  { %1760 = vcosq.f32 %v442_v41  ;;  %v598_v52 = vsel %vm594_vm12, %v578_v20, %v581_v33  ;;  %v600_v38 = vsel %vm596_vm15, %v584_v15, %v599_v27  ;;  %v603_v48 = vsel %vm597_vm14, %v590_v51, 920167782  ;;  %v1291_v33 = vld [vmem:[%s2491_s2 + $0x18] sm:$0xff] }
  0x95   :  { %1762 = vsinq.f32 %v442_v41  ;;  %vm342_vm2 = vweird.f32 %v1890_v4  ;;  %v1562_v28 = vmin.u32 %v524_v2, %v2312_v42  ;;  %v604_v12 = vsel %vm596_vm15, %v587_v30, %v603_v48 }
  0x96   :  { %v606_v49 = vsel %vm594_vm12, %v584_v15, %v587_v30  ;;  %v607_v10 = vsel %vm597_vm14, %v593_v40, 1326507024  ;;  %v605_v39 = vsel %vm595_vm1, %v602_v32, %v604_v12  ;;  %v969_v55 = vsel %vm967_vm3, %v2268_v47, %v347_v25 }
  0x97   :  { %v608_v44 = vsel %vm596_vm15, %v590_v51, %v607_v10  ;;  %vm970_vm0 = vcmp.eq.s32.totalorder %v2279_v57, 2  ;;  %v348_v54 = vsel %vm346_vm9, %v2268_v47, %v347_v25  ;;  %v351_v56 = vsel %vm349_vm10, %v350_v24, %v2283_v43  ;;  %v1289_v25 = vld [vmem:[%s2491_s2 + $0x8] sm:$0xff] }
  0x98   :  { %v526_v53 = vclz %v1562_v28  ;;  %v601_v9 = vsel %vm595_vm1, %v598_v52, %v600_v38  ;;  %vm446_vm4 = vweird.f32 %v1900_v22  ;;  %v609_v26 = vsel %vm595_vm1, %v606_v49, %v608_v44  ;;  %v1419_v52 = vld [vmem:[%s2493_s4] sm:$0x7] }
  0x99   :  { %v2360_v34 = vmul.u32.u64.low %v2303_v36, %v605_v39  ;;  %v2361_v46 = vmul.u32.u64.high %v2303_v36, %v605_v39, %v2360_v34  ;;  %v972_v47 = vsel %vm970_vm0, %v350_v24, %v2283_v43  ;;  %vm449_vm5 = vcmp.lt.s32.totalorder %v2281_v14, 2 }
  0x9a   :  { %v1563_v58 = vadd.s32 4294967294, %v526_v53  ;;  %v2366_v59 = vmul.u32.u64.low %v2303_v36, %v609_v26  ;;  %v2367_v11 = vmul.u32.u64.high %v2303_v36, %v609_v26, %v2366_v59  ;;  %v973_v61 = vsel %vm966_vm11, %v969_v55, %v972_v47 }
  0x9b   :  { %vm450_vm6 = vcmp.eq.s32.totalorder %v2281_v14, 0  ;;  %vm453_vm7 = vcmp.eq.s32.totalorder %v2281_v14, 2  ;;  %v1068_v43 = vand.u32 3, %v2252_v18  ;;  %v514_v57 = vadd.s32 %v2260_v8, %v2256_v19 }
  0x9c   :  { %vm1564_vm8 = vcmp.lt.s32.totalorder %v1563_v58, 0  ;;  %vm1312_vm9 = vcmask 875520   ;;  %v352_v50 = vsel %vm345_vm13, %v348_v54, %v351_v56  ;;  %v617_v5 = vmul.u32 %v2303_v36, %v601_v9 }
  0x9d   :  { %v529_v3 = vsel %vm1564_vm8, 0, %v1563_v58  ;;  %v620_v18 = vadd.s32 1, %v2361_v46  ;;  %1654 = vmatprep.mubr.msk.f32.mxu0 %vm1312_vm9, %v1284_v16  ;;  %v1834_v37 = vmov 0   ;;  %vm1069_vm10 = vcmp.lt.s32.totalorder %v1068_v43, 2 }
  0x9e   :  { %1746 = vset.pattern.permute.xlu0 %v1834_v37  ;;  %v1761_v6 = vpop.eup %1760  ;;  %v530_v19 = vsub.s32 32, %v529_v3  ;;  %v534_v8 = vsub.s32 4294967266, %v529_v3  ;;  %vm1070_vm11 = vcmp.eq.s32.totalorder %v1068_v43, 0  ;;  %1747 = vset.pattern.permute.xlu1 %v1834_v37  ;;  %v531_v45 = vshll.u32 %v2312_v42, %v529_v3 }
  0x9f   :  { %1294 = vperm.xlu0 %1746, %v1288_v62   ;;  %v1763_v23 = vpop.eup %1762  ;;  %v454_v13 = vxor.u32 2147483648, %v1761_v6  ;;  %vm619_vm12 = vc.u32 %v2367_v11, %v2360_v34  ;;  %vm1073_vm13 = vcmp.eq.s32.totalorder %v1068_v43, 2  ;;  %1304 = vperm.xlu1 %1747, %v1290_v7   ;;  %v353_v15 = vsel %vm342_vm2, nan, %v352_v50 }
  0xa0   :  { %v451_v24 = vxor.u32 2147483648, %v1763_v23  ;;  %v532_v36 = vshrl.u32 %v514_v57, %v530_v19  ;;  %v535_v29 = vadd.s32 127, %v534_v8  ;;  %v621_v31 = vsel %vm619_vm12, %v620_v18, %v2361_v46 }
  0xa1   :  { %v455_v20 = vsel %vm453_vm7, %v454_v13, %v1763_v23  ;;  %v622_v30 = vadd.s32 %v621_v31, %v617_v5  ;;  %v1075_v51 = vsel %vm1073_vm13, %v454_v13, %v1763_v23  ;;  %v974_v40 = vsel %vm342_vm2, nan, %v973_v61 }
  0xa2   :  { %v452_v35 = vsel %vm450_vm6, %v1761_v6, %v451_v24  ;;  %v536_v42 = vshll.u32 %v535_v29, 23  ;;  %v1072_v41 = vsel %vm1070_vm11, %v1761_v6, %v451_v24  ;;  %v533_v48 = vor.u32 %v532_v36, %v531_v45 }
  0xa3   :  { %1299 = vperm.xlu0 %1746, %v1289_v25   ;;  %v456_v27 = vsel %vm449_vm5, %v452_v35, %v455_v20  ;;  %v623_v2 = vadd.s32 536870912, %v622_v30  ;;  %v1076_v32 = vsel %vm1069_vm10, %v1072_v41, %v1075_v51  ;;  %1309 = vperm.xlu1 %1747, %v1291_v33   ;;  %vm460_vm14 = vcmp.lt.s32.totalorder %v2062_v60, 0 }
  0xa4   :  { %v457_v38 = vsel %vm446_vm4, nan, %v456_v27  ;;  %v1077_v4 = vsel %vm446_vm4, nan, %v1076_v32  ;;  %v537_v12 = vor.u32 4788187, %v536_v42  ;;  %v540_v44 = vcvt.s32.f32 %v533_v48 }
  0xa5   :  { %v1675_v28 = vpack.c.bf16 %v457_v38, %v353_v15  ;;  %v624_v49 = vshrl.u32 %v623_v2, 30  ;;  %v2420_v14 = vpack.c.bf16 %v1077_v4, %v974_v40  ;;  %v618_v22 = vadd.s32 %v2360_v34, %v2367_v11 }
  0xa6   :  { %v538_v39 = vand.u32 2147483647, %v537_v12  ;;  %vm2427_vm3 = vcmp.le.f32.partialorder %v458_v63, 0.7853982  ;;  %v544_v7 = vsub.s32 4, %v2297_v21  ;;  %vm564_vm1 = vcmp.lt.s32.totalorder %v2201_v17, 0 }
  0xa7   :  { %1422 = vperm.xlu0 %1746, %v1419_v52   ;;  %1676 = vmatprep.subr.bf16.mxu0 %v1675_v28  ;;  %v625_v10 = vshll.u32 %v624_v49, 30  ;;  %v648_v37 = vsub.s32 4, %v624_v49  ;;  %vm563_vm2 = vcmp.le.f32.partialorder %v562_v0, 0.7853982  ;;  %vm550_vm7 = vweird.f32 %v2062_v60 }
  0xa8   :  { %1678 = vmatpush3.bf16.msra.mxu0 %v1675_v28  ;;  %v541_v56 = vmul.f32 %v540_v44, %v538_v39  ;;  %v545_v5 = vsel %vm460_vm14, %v544_v7, %v2297_v21  ;;  %vm654_vm10 = vweird.f32 %v2201_v17 }
  0xa9   :  { %v626_v55 = vsub.s32 %v622_v30, %v625_v10  ;;  %v547_v6 = vsel %vm2427_vm3, 0, %v545_v5  ;;  %v649_v23 = vsel %vm564_vm1, %v648_v37, %v624_v49 }
  0xaa   :  { %v542_v26 = vxor.u32 2147483648, %v541_v56  ;;  %v551_v13 = vadd.s32 3, %v547_v6  ;;  %v651_v24 = vsel %vm563_vm2, 0, %v649_v23  ;;  %v1171_v51 = vand.u32 3, %v547_v6 }
  0xab   :  { %v628_v54 = vsub.s32 0, %v626_v55  ;;  %v655_v31 = vadd.s32 3, %v651_v24  ;;  %v1274_v35 = vand.u32 3, %v651_v24 }
  0xac   :  { %v543_v59 = vsel %vm460_vm14, %v542_v26, %v541_v56  ;;  %v552_v29 = vand.u32 3, %v551_v13  ;;  %vm1176_vm12 = vcmp.eq.s32.totalorder %v1171_v51, 2  ;;  %vm1173_vm13 = vcmp.eq.s32.totalorder %v1171_v51, 0  ;;  %v1776_v26 = vld [vmem:[#allocation2] sm:$0xff] }
  0xad   :  { %v1566_v53 = vmin.u32 %v628_v54, %v626_v55  ;;  %v546_v34 = vsel %vm2427_vm3, %v2062_v60, %v543_v59  ;;  %v656_v20 = vand.u32 3, %v655_v31  ;;  %vm1276_vm14 = vcmp.eq.s32.totalorder %v1274_v35, 0  ;;  %v1285_v60 = vld [vmem:[%s2490_s1 + $0x8] sm:$0xff] }
  0xae   :  { %1764 = vcosq.f32 %v546_v34  ;;  %vm554_vm0 = vcmp.eq.s32.totalorder %v552_v29, 0  ;;  %vm557_vm4 = vcmp.eq.s32.totalorder %v552_v29, 2  ;;  %vm553_vm5 = vcmp.lt.s32.totalorder %v552_v29, 2 }
  0xaf   :  { %v630_v9 = vclz %v1566_v53  ;;  %1766 = vsinq.f32 %v546_v34  ;;  %vm661_vm6 = vcmp.eq.s32.totalorder %v656_v20, 2  ;;  %vm658_vm8 = vcmp.eq.s32.totalorder %v656_v20, 0 }
  0xb0   :  { %vm657_vm11 = vcmp.lt.s32.totalorder %v656_v20, 2  ;;  %vm1172_vm3 = vcmp.lt.s32.totalorder %v1171_v51, 2 }
  0xb1   :  { %v1567_v46 = vadd.s32 4294967294, %v630_v9  ;;  %v36_v9 = vld [vmem:[#allocation2 + $0x8] sm:$0x7] }
  0xb3   :  { %vm1568_vm15 = vcmp.lt.s32.totalorder %v1567_v46, 0 }
  0xb4   :  { %v633_v58 = vsel %vm1568_vm15, 0, %v1567_v46  ;;  %vm1279_vm15 = vcmp.eq.s32.totalorder %v1274_v35, 2  ;;  %v1695_v46 = vpack.c.bf16 %v36_v9, %v1776_v26 }
  0xb5   :  { %v634_v61 = vsub.s32 32, %v633_v58  ;;  %v635_v16 = vshll.u32 %v626_v55, %v633_v58  ;;  %v638_v43 = vsub.s32 4294967266, %v633_v58 }
  0xb7   :  { %v636_v62 = vshrl.u32 %v618_v22, %v634_v61  ;;  %v639_v57 = vadd.s32 127, %v638_v43  ;;  %v1838_v22 = vmov 0.0  }
  0xb8   :  { %v1765_v21 = vpop.eup %1764 }
  0xb9   :  { %v637_v11 = vor.u32 %v636_v62, %v635_v16  ;;  %v640_v63 = vshll.u32 %v639_v57, 23  ;;  %v1767_v36 = vpop.eup %1766  ;;  %v558_v15 = vxor.u32 2147483648, %v1765_v21 }
  0xba   :  { %v555_v33 = vxor.u32 2147483648, %v1767_v36 }
  0xbb   :  { %v641_v50 = vor.u32 4788187, %v640_v63  ;;  %v644_v3 = vcvt.s32.f32 %v637_v11  ;;  %v559_v30 = vsel %vm557_vm4, %v558_v15, %v1767_v36  ;;  %v1178_v4 = vsel %vm1176_vm12, %v558_v15, %v1767_v36 }
  0xbc   :  { %v556_v0 = vsel %vm554_vm0, %v1765_v21, %v555_v33  ;;  %v1175_v12 = vsel %vm1173_vm13, %v1765_v21, %v555_v33  ;;  %vm1835_vm0 = vmmov 1  }
  0xbd   :  { %v642_v18 = vand.u32 2147483647, %v641_v50  ;;  %v560_v41 = vsel %vm553_vm5, %v556_v0, %v559_v30  ;;  %v1179_v44 = vsel %vm1172_vm3, %v1175_v12, %v1178_v4  ;;  %vm1837_vm5 = vmmov 0  }
  0xbe   :  { %v561_v52 = vsel %vm550_vm7, nan, %v560_v41  ;;  %v1180_v54 = vsel %vm550_vm7, nan, %v1179_v44  ;;  %1668 = vmatprep.mubr.msk.f32.mxu1 %vm1837_vm5, %v1838_v22  ;;  %vm1516_vm7 = vcmask 1046528  }
  0xbf   :  { %v645_v19 = vmul.f32 %v644_v3, %v642_v18 }
  0xc1   :  { %v646_v8 = vxor.u32 2147483648, %v645_v19 }
  0xc3   :  { %v647_v45 = vsel %vm564_vm1, %v646_v8, %v645_v19  ;;  %vm1275_vm1 = vcmp.lt.s32.totalorder %v1274_v35, 2  ;;  %v1418_v19 = vld [vmem:[%s2492_s3] sm:$0x7]  ;;  %s1839_s3 = smov [#allocation5]  }
  0xc4   :  { %v650_v25 = vsel %vm563_vm2, %v2201_v17, %v647_v45  ;;  %vm1325_vm2 = vcmask 1042432   ;;  %v1287_v17 = vld [vmem:[%s2490_s1 + $0x18] sm:$0xff]  ;;  %s1536_s23 = sshll.u32 %s1839_s3, 4  ;;  %s1537_s23 = int_to_ptr.vmem [resolvable:$true] %s1536_s23 }
  0xc5   :  { %1768 = vcosq.f32 %v650_v25  ;;  %vm1696_vm4 = vmpackc.low %vm1325_vm2, %vm1835_vm0  ;;  %s1799_s24 = scalar_lea.vmem %s1537_s23, 128  ;;  %p1804_p9 = scmp.lt.s32.totalorder %s1537_s23, %s1537_s23 }
  0xc6   :  { %1770 = vsinq.f32 %v650_v25  ;;  %p1800_p8 = scmp.ne.s32.totalorder %s1537_s23, %s1799_s24  ;;  %p1805_p10 = scmp.lt.s32.totalorder %s1799_s24, %s1799_s24 }
  0xc8   :  { %p1806_p11 = por %p1805_p10, %p1804_p9 }
  0xca   :  { %p1807_p12 = pnand %p1806_p11, %p1800_p8 }
  0xcf   :  { %v1769_v42 = vpop.eup %1768 }
  0xd0   :  { %v1771_v40 = vpop.eup %1770  ;;  %v662_v27 = vxor.u32 2147483648, %v1769_v42 }
  0xd1   :  { %v659_v2 = vxor.u32 2147483648, %v1771_v40 }
  0xd2   :  { %v663_v32 = vsel %vm661_vm6, %v662_v27, %v1771_v40  ;;  %v1281_v10 = vsel %vm1279_vm15, %v662_v27, %v1771_v40  ;;  %vm1514_vm6 = vcmask 1045504  }
  0xd3   :  { %v660_v38 = vsel %vm658_vm8, %v1769_v42, %v659_v2  ;;  %v1278_v49 = vsel %vm1276_vm14, %v1769_v42, %v659_v2  ;;  %v1524_v42 = vlaneseq }
  0xd4   :  { %v664_v48 = vsel %vm657_vm11, %v660_v38, %v663_v32  ;;  %v1282_v55 = vsel %vm1275_vm1, %v1278_v49, %v1281_v10 }
  0xd5   :  { %v665_v28 = vsel %vm654_vm10, nan, %v664_v48  ;;  %v1283_v56 = vsel %vm654_vm10, nan, %v1282_v55  ;;  %v1525_v41 = vshrl.u32 %v1524_v42, 7 }
  0xd6   :  { %v1679_v39 = vpack.c.bf16 %v665_v28, %v561_v52  ;;  %v1691_v53 = vpack.c.bf16 %v1283_v56, %v1180_v54 }
  0xd7   :  { %vm1526_vm8 = vcmp.eq.s32.totalorder %v1525_v41, 7 }
  0xd8   :  { %1680 = vmatprep.subr.bf16.mxu0 %v1679_v39  ;;  %v1527_v27 = vsel %vm1526_vm8, 0.01, %v1838_v22 }
  0xd9   :  { %1682 = vmatpush3.bf16.msra.mxu0 %v1679_v39 }
  0xda   :  { %1684 = vmatprep.subr.bf16.mxu0 %v2198_v1 }
  0xdd   :  { %1686 = vmatpush3.bf16.msra.mxu0 %v2198_v1  ;;  %v1286_v1 = vld [vmem:[%s2490_s1 + $0x10] sm:$0xff] }
  0xde   :  { %1688 = vmatprep.subr.bf16.mxu0 %v2420_v14 }
  0xe1   :  { %1690 = vmatpush3.bf16.msra.mxu0 %v2420_v14  ;;  %v1836_v14 = vmov 0.0|0.0  }
  0xe2   :  { %1692 = vmatprep.subr.bf16.mxu0 %v1691_v53  ;;  %1701 = vmatprep.subr.bf16.mxu1 %v1836_v14 }
  0xe5   :  { %1694 = vmatpush3.bf16.msra.mxu0 %v1691_v53 }
  0xe6   :  { %1697 = vmatprep.subr.msk.bf16.mxu0 %vm1696_vm4, %v1695_v46 }
  0xe9   :  { %1700 = vmatpush3.bf16.msk.msra.mxu0 %vm1696_vm4, %v1695_v46 }
  0xec   :  { %1655 = vmatmul.mubr.msk.f32.vlgmr.msra.gmra.mrb[0].mxu0 %vm1312_vm9, %v1285_v60 }
  0xed   :  { %1657 = vmatprep.mubr.msk.f32.mxu0 %vm1312_vm9, %v1286_v1 }
  0xf0   :  { %1658 = vmatmul.mubr.msk.f32.gmra.mrb[2].mxu0 %vm1312_vm9, %v1287_v17  ;;  %vm1425_vm9 = vcmask 261120  }
 0x11e   :  { %v1295_v47 = vpop.permute.xlu0 %1294  ;;  %v1305_v58 = vpop.permute.xlu1 %1304 }
 0x122   :  { %v1300_v59 = vpop.permute.xlu0 %1299  ;;  %v1310_v7 = vpop.permute.xlu1 %1309 }
 0x126   :  { %v1423_v8 = vpop.permute.xlu0 %1422 }
 0x1bf   :  { %v1656_v61 = vpop.f32.mrb[0].mxu0 }
 0x1c0   :  { %v1401_v16 = vadd.f32 %v1656_v61, %v1300_v59  ;;  %v1395_v43 = vpop.f32.mrb[1].mxu0 }
 0x1c1   :  { %v1396_v62 = vadd.f32 %v1395_v43, %v1295_v47 }
 0x1c2   :  { %v1415_v57 = vmax.f32 %v1401_v16, 0.0 }
 0x1c3   :  { %v1414_v34 = vmax.f32 %v1396_v62, 0.0  ;;  %v1659_v11 = vpop.f32.mrb[2].mxu0 }
 0x1c4   :  { %v1411_v63 = vadd.f32 %v1659_v11, %v1310_v7  ;;  %v1405_v50 = vpop.f32.mrb[3].mxu0 }
 0x1c5   :  { %v1406_v3 = vadd.f32 %v1405_v50, %v1305_v58  ;;  %v1702_v5 = vpack.c.bf16 %v1415_v57, %v1414_v34 }
 0x1c6   :  { %v1417_v18 = vmax.f32 %v1411_v63, 0.0 }
 0x1c7   :  { %v1416_v37 = vmax.f32 %v1406_v3, 0.0  ;;  %1703 = vmatpush3.bf16.msra.mxu1 %v1702_v5 }
 0x1c8   :  { %1704 = vmatprep.subr.bf16.mxu1 %v1836_v14 }
 0x1c9   :  { %v1705_v6 = vpack.c.bf16 %v1417_v18, %v1416_v37 }
 0x1cb   :  { %1706 = vmatpush3.bf16.msra.mxu1 %v1705_v6 }
 0x1ce   :  { %1669 = vmatmul.mubr.msk.f32.vlgmr.msra.gmra.mrb[0].mxu1 %vm1425_vm9, %v1418_v19 }
 0x2a1   :  { %v1495_v23 = vpop.f32.mrb[0].mxu1 }
 0x2a2   :  { %v1496_v13 = vadd.f32 %v1495_v23, %v1423_v8  ;;  %v1670_v45 = vpop.f32.mrb[1].mxu1 }
 0x2a4   :  { %v1600_v25 = vclamps-f32 %v1496_v13, 10.0  ;;  %v1601_v24 = vadd.f32 -2.0, %v1496_v13  ;;  %v1602_v21 = vadd.f32 -1.0, %v1496_v13  ;;  %v1599_v36 = vadd.f32 -1.0986123, %v1496_v13 }
 0x2a6   :  { %v1505_v29 = vrot.slane %v1600_v25, 5  ;;  %v1508_v31 = vrot.slane %v1601_v24, 4  ;;  %v1511_v33 = vrot.slane %v1602_v21, 3 }
 0x2a8   :  { %v1513_v15 = vsel %vm1325_vm2, %v1599_v36, %v1505_v29 }
 0x2a9   :  { %v1515_v20 = vsel %vm1514_vm6, %v1513_v15, %v1508_v31 }
 0x2aa   :  { %v1517_v0 = vsel %vm1516_vm7, %v1515_v20, %v1511_v33 }
 0x2ab   :  { %v1518_v30 = vsub.f32 0.0, %v1517_v0 }
 0x2ad   :  { %v1519_v51 = vmul.f32 1.442695, %v1518_v30 }
 0x2af   :  { %1772 = vpow2.f32 %v1519_v51 }
 0x2b9   :  { %v1773_v35 = vpop.eup %1772 }
 0x2ba   :  { %v1521_v40 = vadd.f32 1.0, %v1773_v35 }
 0x2bc   :  { %1774 = vrcp.f32 %v1521_v40 }
 0x2c6   :  { %v1775_v2 = vpop.eup %1774 }
 0x2c7   :  { %v1528_v32 = vmax.f32 %v1775_v2, %v1527_v27 }
 0x2c9   :  { %1529 = vst [vmem:[#allocation5] sm:$0xff] %v1528_v32 }
 0x2ca   :  { %1810 = shalt.err (!%p1807_p12)
}
 0x2cb   :  { %s1811_s27 = scalar_lea.hbm %s2494_s5, 128 }
 0x2cc   :  { %p1812_p13 = scmp.ne.s32.totalorder %s2494_s5, %s1811_s27  ;;  %p1815_p0 = scmp.lt.u32.totalorder %s1811_s27, %s2494_s5 }
 0x2ce   :  { %p1817_p1 = pnand %p1815_p0, %p1812_p13 }
 0x2d0   :  { %1820 = shalt.err (!%p1817_p1)
}
 0x2d1   :  { %1539 = dma.vmem_to_hbm [thread:$0]  %s1537_s23, 128, %s2494_s5, [#allocation4]  }
 0x2d2   :  { %1823 = dma.done.wait [#allocation4], 128  }
 0x2d3   :  { %1824 = vsyncadd [#allocation4], 4294967168 }
 0x2d4   :  { %1543 = vsyncpa [#allocation3], 1 }
 0x2d5   :  { %1544 = vsyncpa [#allocation4], 1 }

</bundles_post_ra>
